<compile_context>
chip_gen: v6e
topology: v6e:2x2x1
jax: 0.10.0
libtpu: 0.0.40
codegen_flags: <defaults>
</compile_context>

<pallas_src>
import functools

import jax
import jax.numpy as jnp
from jax.experimental import pallas as pl
from jax.experimental.pallas import tpu as pltpu


# --------------------------- feature / hw probing -----------------------------

_BUFFERED_OK = None


def _probe_copy_kernel(x_ref, o_ref):
    o_ref[...] = x_ref[...]


def _probe_buffered():
    """Check that pipeline_mode=pl.Buffered(1) is supported on this jax/TPU."""
    try:
        fn = pl.pallas_call(
            _probe_copy_kernel,
            out_shape=jax.ShapeDtypeStruct((16, 128), jnp.float32),
            grid=(2,),
            in_specs=[pl.BlockSpec((8, 128), lambda i: (0, 0),
                                   pipeline_mode=pl.Buffered(1))],
            out_specs=pl.BlockSpec((8, 128), lambda i: (i, 0)),
        )
        jax.block_until_ready(fn(jnp.zeros((8, 128), jnp.float32)))
        return True
    except Exception:
        return False


def _buffered_supported():
    global _BUFFERED_OK
    if _BUFFERED_OK is None:
        _BUFFERED_OK = _probe_buffered()
    return _BUFFERED_OK


def _resident_spec(block_shape, index_map):
    """BlockSpec for a grid-invariant operand: single-buffer it if supported."""
    if _buffered_supported():
        return pl.BlockSpec(block_shape, index_map, pipeline_mode=pl.Buffered(1))
    return pl.BlockSpec(block_shape, index_map)


def _vmem_limit_bytes():
    """Per-generation scoped-VMEM limit (~75% of capacity, capped at 100 MiB)."""
    try:
        cap = int(pltpu.get_tpu_info().vmem_capacity_bytes)
        return max(32 * 1024 * 1024, min(cap * 3 // 4, 100 * 1024 * 1024))
    except Exception:
        return 32 * 1024 * 1024


def _pick_tile(n, *, prefer_large):
    """Largest of (512,)256,128 dividing n (n is always a multiple of 128)."""
    prefs = (512, 256, 128) if prefer_large else (256, 128)
    for t in prefs:
        if n % t == 0:
            return t
    return n


# ----------------------------- in-kernel helpers -----------------------------

def _layernorm(x, gamma, beta, eps=1e-5):
    # x: (N, D) f32, gamma/beta: (1, D) f32
    mean = jnp.mean(x, axis=-1, keepdims=True)
    var = jnp.mean((x - mean) ** 2, axis=-1, keepdims=True)
    return (x - mean) * jax.lax.rsqrt(var + eps) * gamma + beta


def _gelu_exact(x):
    # matches torch.nn.GELU() (erf form), f32 math
    return 0.5 * x * (1.0 + jax.lax.erf(x * 0.7071067811865475))


# ------------------------------ Pallas kernels -------------------------------

def patch_embed_kernel(p_ref, w_ref, bias_ref, o_ref):
    # p_ref: (1, tn, patch_dim) bf16 (cls row / pad rows are zero)
    # w_ref: (patch_dim, D) bf16, bias_ref: (tn, D) f32 (cls + pos + bias fused)
    emb = jnp.dot(p_ref[0], w_ref[...], preferred_element_type=jnp.float32)
    o_ref[0] = (emb + bias_ref[...]).astype(o_ref.dtype)


def attention_kernel(xf_ref, xq_ref, g_ref, b_ref, wqkv_ref, wo_ref, bo_ref,
                     o_ref, qkv_scr, head_scr, *, heads, dim_head, n_valid,
                     scale):
    # grid = (batch, q_tiles); heads is a static (unrolled) in-kernel loop.
    # xf_ref : (1, N_pad, D) bf16  full sequence (for K/V)
    # xq_ref : (1, tq, D)    bf16  query tile (residual)
    # wqkv   : (heads, D, 3*dh) bf16 head-major fused QKV weight
    # wo     : (inner, D) bf16, bo: (1, D) f32
    # qkv_scr: (N_pad, 3*dh) f32 VMEM, head_scr: (tq, inner) f32 VMEM
    qi = pl.program_id(1)
    n_pad = xf_ref.shape[1]
    tq = xq_ref.shape[1]
    dh = dim_head

    x_q = xq_ref[0].astype(jnp.float32)                       # (tq, D) residual
    # LayerNorm hoisted out of the head loop (computed once per grid step).
    xn = _layernorm(xf_ref[0].astype(jnp.float32),
                    g_ref[...], b_ref[...]).astype(jnp.bfloat16)   # (N_pad, D)

    q_start = pl.multiple_of(qi * tq, tq)
    for h in range(heads):                                    # static unroll
        # Fused QKV: one matmul per head, K = D, output width 3*dh.
        qkv_scr[...] = jnp.dot(xn, wqkv_ref[h],
                               preferred_element_type=jnp.float32)  # (N_pad,3dh)
        q = qkv_scr[pl.ds(q_start, tq), :dh] * scale          # (tq, dh)
        k = qkv_scr[:, dh:2 * dh]                             # (N_pad, dh)
        v = qkv_scr[:, 2 * dh:3 * dh]                         # (N_pad, dh)

        s = jax.lax.dot_general(q, k, (((1,), (1,)), ((), ())),
                                preferred_element_type=jnp.float32)  # (tq,N_pad)
        if n_pad > n_valid:                                   # mask pad keys
            col = jax.lax.broadcasted_iota(jnp.int32, s.shape, 1)
            s = jnp.where(col < n_valid, s, -1e30)
        s = s - jnp.max(s, axis=-1, keepdims=True)
        e = jnp.exp(s)
        p = e * pl.reciprocal(jnp.sum(e, axis=-1, keepdims=True), approx=True)

        # Stash this head's output at a static lane offset (concat via scratch).
        head_scr[:, h * dh:(h + 1) * dh] = jnp.dot(
            p, v, preferred_element_type=jnp.float32)          # (tq, dh)

    # Single full-width output projection: K = heads*dim_head.
    o_cat = head_scr[...].astype(jnp.bfloat16)                 # (tq, inner)
    proj = jnp.dot(o_cat, wo_ref[...], preferred_element_type=jnp.float32)
    o_ref[0] = (x_q + proj + bo_ref[...]).astype(o_ref.dtype)


def mlp_kernel(x_ref, g_ref, b_ref, w1_ref, b1_ref, w2_ref, b2_ref, o_ref):
    # x_ref: (1, tn, D) bf16 -> o_ref = x + W2(gelu(W1(LN(x))))
    x = x_ref[0].astype(jnp.float32)
    xn = _layernorm(x, g_ref[...], b_ref[...]).astype(jnp.bfloat16)
    h1 = jnp.dot(xn, w1_ref[...], preferred_element_type=jnp.float32) + b1_ref[...]
    h1 = _gelu_exact(h1).astype(jnp.bfloat16)
    h2 = jnp.dot(h1, w2_ref[...], preferred_element_type=jnp.float32) + b2_ref[...]
    o_ref[0] = (x + h2).astype(o_ref.dtype)


# ------------------------------ pallas wrappers -------------------------------

def patch_embed(patches_pad, w, bias_all, *, tn, vmem_limit):
    B, N_pad, pd = patches_pad.shape
    D = w.shape[1]
    return pl.pallas_call(
        patch_embed_kernel,
        out_shape=jax.ShapeDtypeStruct((B, N_pad, D), jnp.bfloat16),
        grid=(B, N_pad // tn),
        in_specs=[pl.BlockSpec((1, tn, pd), lambda b, t: (b, t, 0)),
                  _resident_spec((pd, D), lambda b, t: (0, 0)),
                  pl.BlockSpec((tn, D), lambda b, t: (t, 0))],
        out_specs=pl.BlockSpec((1, tn, D), lambda b, t: (b, t, 0)),
        compiler_params=pltpu.CompilerParams(
            dimension_semantics=("parallel", "parallel"),
            vmem_limit_bytes=vmem_limit),
    )(patches_pad, w, bias_all)


def attention_block(x, ln_g, ln_b, wqkv, wo, bo, *, n_valid, tq, heads,
                    dim_head, vmem_limit):
    B, N_pad, D = x.shape
    inner = heads * dim_head
    kernel = functools.partial(attention_kernel, heads=heads, dim_head=dim_head,
                               n_valid=n_valid, scale=dim_head ** -0.5)
    return pl.pallas_call(
        kernel,
        out_shape=jax.ShapeDtypeStruct((B, N_pad, D), jnp.bfloat16),
        grid=(B, N_pad // tq),
        in_specs=[
            pl.BlockSpec((1, N_pad, D), lambda b, q: (b, 0, 0)),     # x (K/V)
            pl.BlockSpec((1, tq, D), lambda b, q: (b, q, 0)),        # x q-tile
            _resident_spec((1, D), lambda b, q: (0, 0)),             # ln1 gamma
            _resident_spec((1, D), lambda b, q: (0, 0)),             # ln1 beta
            _resident_spec((heads, D, 3 * dim_head),
                           lambda b, q: (0, 0, 0)),                  # Wqkv
            _resident_spec((inner, D), lambda b, q: (0, 0)),         # Wo
            _resident_spec((1, D), lambda b, q: (0, 0)),             # bo
        ],
        out_specs=pl.BlockSpec((1, tq, D), lambda b, q: (b, q, 0)),
        scratch_shapes=[pltpu.VMEM((N_pad, 3 * dim_head), jnp.float32),
                        pltpu.VMEM((tq, inner), jnp.float32)],
        compiler_params=pltpu.CompilerParams(
            dimension_semantics=("parallel", "parallel"),
            vmem_limit_bytes=vmem_limit),
    )(x, x, ln_g, ln_b, wqkv, wo, bo)


def mlp_block(x, ln_g, ln_b, w1, b1, w2, b2, *, tn, vmem_limit):
    B, N_pad, D = x.shape
    mlp_dim = w1.shape[1]
    return pl.pallas_call(
        mlp_kernel,
        out_shape=jax.ShapeDtypeStruct((B, N_pad, D), jnp.bfloat16),
        grid=(B, N_pad // tn),
        in_specs=[
            pl.BlockSpec((1, tn, D), lambda b, t: (b, t, 0)),        # x tile
            _resident_spec((1, D), lambda b, t: (0, 0)),             # ln2 gamma
            _resident_spec((1, D), lambda b, t: (0, 0)),             # ln2 beta
            _resident_spec((D, mlp_dim), lambda b, t: (0, 0)),       # W1
            _resident_spec((1, mlp_dim), lambda b, t: (0, 0)),       # b1
            _resident_spec((mlp_dim, D), lambda b, t: (0, 0)),       # W2
            _resident_spec((1, D), lambda b, t: (0, 0)),             # b2
        ],
        out_specs=pl.BlockSpec((1, tn, D), lambda b, t: (b, t, 0)),
        compiler_params=pltpu.CompilerParams(
            dimension_semantics=("parallel", "parallel"),
            vmem_limit_bytes=vmem_limit),
    )(x, ln_g, ln_b, w1, b1, w2, b2)


# ------------------------------- parameters -----------------------------------

def _q(w):
    # quantize weights onto the bf16 grid but keep an f32 master copy so the
    # pure-JAX reference uses numerically identical weights.
    return w.astype(jnp.bfloat16).astype(jnp.float32)


def init_vit_params(key, *, image_size, patch_size, dim, depth, heads,
                    mlp_dim, channels, dim_head):
    ph = pw = patch_size
    num_patches = (image_size // ph) * (image_size // pw)
    patch_dim = channels * ph * pw
    inner = heads * dim_head

    keys = jax.random.split(key, 4 + depth)
    p = {}
    p["pe_w"] = _q(0.02 * jax.random.normal(keys[0], (patch_dim, dim), jnp.float32))
    p["pe_b"] = 0.01 * jax.random.normal(keys[1], (1, dim), jnp.float32)
    p["pos_embedding"] = jax.random.normal(keys[2], (1, num_patches + 1, dim),
                                           jnp.float32)
    p["cls_token"] = jax.random.normal(keys[3], (1, 1, dim), jnp.float32)

    layers = []
    for l in range(depth):
        lk = jax.random.split(keys[4 + l], 6)
        layers.append((
            jnp.ones((1, dim), jnp.float32),                                     # ln1 g
            jnp.zeros((1, dim), jnp.float32),                                    # ln1 b
            _q(0.02 * jax.random.normal(lk[0], (dim, 3 * inner), jnp.float32)),  # Wqkv
            _q(0.02 * jax.random.normal(lk[1], (inner, dim), jnp.float32)),      # Wo
            0.01 * jax.random.normal(lk[2], (1, dim), jnp.float32),              # bo
            jnp.ones((1, dim), jnp.float32),                                     # ln2 g
            jnp.zeros((1, dim), jnp.float32),                                    # ln2 b
            _q(0.02 * jax.random.normal(lk[3], (dim, mlp_dim), jnp.float32)),    # W1
            0.01 * jax.random.normal(lk[4], (1, mlp_dim), jnp.float32),          # b1
            _q(0.02 * jax.random.normal(lk[5], (mlp_dim, dim), jnp.float32)),    # W2
            jnp.zeros((1, dim), jnp.float32),                                    # b2
        ))
    p["layers"] = layers
    return p


def prepare_pallas_params(params, *, heads, dim_head):
    """Head-major fused-QKV, bf16 weight layout for the Pallas kernels."""
    out = {"pe_w": params["pe_w"].astype(jnp.bfloat16), "layers": []}
    for lp in params["layers"]:
        g1, b1_, wqkv, wo, bo, g2, b2_, w1, bb1, w2, bb2 = lp
        D = wqkv.shape[0]
        inner = heads * dim_head
        wq = wqkv[:, :inner].reshape(D, heads, dim_head)
        wk = wqkv[:, inner:2 * inner].reshape(D, heads, dim_head)
        wv = wqkv[:, 2 * inner:].reshape(D, heads, dim_head)
        # (heads, D, 3*dim_head): per head [q | k | v] columns, one matmul/head.
        wqkv_hm = jnp.transpose(jnp.concatenate([wq, wk, wv], axis=-1),
                                (1, 0, 2)).astype(jnp.bfloat16)
        out["layers"].append(dict(
            ln1_g=g1, ln1_b=b1_,
            wqkv=wqkv_hm,
            wo=wo.astype(jnp.bfloat16),       # (inner, D), rows in (h d) order
            bo=bo, ln2_g=g2, ln2_b=b2_,
            w1=w1.astype(jnp.bfloat16), b1=bb1,
            w2=w2.astype(jnp.bfloat16), b2=bb2))
    return out


# ------------------------------- ViT forward ----------------------------------

def vit_forward(img, params, *, patch_size, heads, dim_head, mlp_dim,
                out_indices):
    B, C, H, W = img.shape
    ph = pw = patch_size
    hh, ww = H // ph, W // pw
    n = hh * ww
    D = params["pe_w"].shape[1]
    N = n + 1                                  # tokens incl. cls
    N_pad = -(-N // 128) * 128                 # lane-dense key/token count

    vmem_limit = _vmem_limit_bytes()
    prefer_large = vmem_limit >= 64 * 1024 * 1024   # v5e/v6e -> bigger tiles
    t_tile = _pick_tile(N_pad, prefer_large=prefer_large)
    q_tile = _pick_tile(N_pad, prefer_large=prefer_large)

    pparams = prepare_pallas_params(params, heads=heads, dim_head=dim_head)

    # Rearrange 'b c (h p1) (w p2) -> b (h w) (p1 p2 c)'  (glue, plain JAX)
    x = img.reshape(B, C, hh, ph, ww, pw)
    x = jnp.transpose(x, (0, 2, 4, 3, 5, 1))                 # b h w p1 p2 c
    patches = x.reshape(B, n, ph * pw * C)

    # pad tokens: row 0 reserved for cls, tail rows are padding (zeros)
    patches_pad = jnp.zeros((B, N_pad, patches.shape[-1]), jnp.bfloat16)
    patches_pad = patches_pad.at[:, 1:N].set(patches.astype(jnp.bfloat16))

    # fused per-token bias: cls + pos on row 0, linear bias + pos on patch rows
    bias_all = jnp.zeros((N_pad, D), jnp.float32)
    bias_all = bias_all.at[0].set(params["cls_token"][0, 0]
                                  + params["pos_embedding"][0, 0])
    bias_all = bias_all.at[1:N].set(params["pe_b"][0]
                                    + params["pos_embedding"][0, 1:N])

    # Patch embedding (+ cls + pos fused), dropout(p=0) is identity.
    x = patch_embed(patches_pad, pparams["pe_w"], bias_all,
                    tn=t_tile, vmem_limit=vmem_limit)          # (B, N_pad, D)

    outs = []
    for idx, lp in enumerate(pparams["layers"]):
        x = attention_block(x, lp["ln1_g"], lp["ln1_b"], lp["wqkv"], lp["wo"],
                            lp["bo"], n_valid=N, tq=q_tile, heads=heads,
                            dim_head=dim_head, vmem_limit=vmem_limit)
        x = mlp_block(x, lp["ln2_g"], lp["ln2_b"], lp["w1"], lp["b1"],
                      lp["w2"], lp["b2"], tn=t_tile, vmem_limit=vmem_limit)
        if idx in out_indices:
            outs.append(x)
    # TODO(synk): fuse the MLP into the attention finalize (or alias the
    #             activation buffer) to save one (B,N,D) HBM round-trip/layer.

    # Rearrange 'b (h w) c -> b c h w' on real tokens (cls + padding dropped)
    final = []
    for t in outs:
        t = t[:, 1:N, :].astype(jnp.float32).reshape(B, hh, ww, D)
        final.append(jnp.transpose(t, (0, 3, 1, 2)))
    return final


# ------------------------------ pure-JAX reference -----------------------------

def vit_reference(img, params, *, patch_size, heads, dim_head, mlp_dim,
                  out_indices):
    B, C, H, W = img.shape
    ph = pw = patch_size
    hh, ww = H // ph, W // pw
    x = img.reshape(B, C, hh, ph, ww, pw)
    x = jnp.transpose(x, (0, 2, 4, 3, 5, 1)).reshape(B, hh * ww, ph * pw * C)
    x = x @ params["pe_w"] + params["pe_b"]
    n = x.shape[1]
    cls = jnp.broadcast_to(params["cls_token"], (B, 1, x.shape[-1]))
    x = jnp.concatenate([cls, x], axis=1) + params["pos_embedding"][:, :n + 1]

    inner = heads * dim_head
    outs = []
    for idx, lp in enumerate(params["layers"]):
        (g1, b1_, wqkv, wo, bo, g2, b2_, w1, bb1, w2, bb2) = lp
        xn = _layernorm(x, g1, b1_)
        qkv = xn @ wqkv
        q, k, v = jnp.split(qkv, 3, axis=-1)
        def heads_view(t):
            return jnp.transpose(t.reshape(B, -1, heads, dim_head), (0, 2, 1, 3))
        q, k, v = map(heads_view, (q, k, v))
        dots = jnp.einsum('bhnd,bhmd->bhnm', q, k) * (dim_head ** -0.5)
        attn = jax.nn.softmax(dots, axis=-1)
        o = jnp.einsum('bhnm,bhmd->bhnd', attn, v)
        o = jnp.transpose(o, (0, 2, 1, 3)).reshape(B, -1, inner)
        x = x + (o @ wo + bo)
        xn2 = _layernorm(x, g2, b2_)
        h = _gelu_exact(xn2 @ w1 + bb1)
        x = x + (h @ w2 + bb2)
        if idx in out_indices:
            outs.append(x)
    final = []
    for t in outs:
        t = t[:, 1:, :].reshape(B, hh, ww, -1)
        final.append(jnp.transpose(t, (0, 3, 1, 2)))
    return final


# ------------------------------------ main -------------------------------------

if __name__ == "__main__":
    # Small config consistent with the module (depth=2, out_indices=(0, 1)
    # satisfies out_indices[-1] == depth - 1).
    IMAGE_SIZE = 16
    PATCH_SIZE = 8
    CHANNELS = 4
    DIM = 32
    DEPTH = 2
    HEADS = 2
    DIM_HEAD = 8
    MLP_DIM = 64
    OUT_INDICES = (0, 1)
    BATCH = 2

    key = jax.random.PRNGKey(0)
    k_img, k_par = jax.random.split(key)
    img = jax.random.normal(k_img, (BATCH, CHANNELS, IMAGE_SIZE, IMAGE_SIZE),
                            jnp.float32)

    params = init_vit_params(k_par, image_size=IMAGE_SIZE, patch_size=PATCH_SIZE,
                             dim=DIM, depth=DEPTH, heads=HEADS, mlp_dim=MLP_DIM,
                             channels=CHANNELS, dim_head=DIM_HEAD)

    outs = vit_forward(img, params, patch_size=PATCH_SIZE, heads=HEADS,
                       dim_head=DIM_HEAD, mlp_dim=MLP_DIM,
                       out_indices=OUT_INDICES)
    outs = [jax.block_until_ready(o) for o in outs]

    refs = vit_reference(img, params, patch_size=PATCH_SIZE, heads=HEADS,
                         dim_head=DIM_HEAD, mlp_dim=MLP_DIM,
                         out_indices=OUT_INDICES)
    refs = [jax.block_until_ready(r) for r in refs]

    assert len(outs) == len(OUT_INDICES)
    for o, r in zip(outs, refs):
        assert o.shape == (BATCH, DIM, IMAGE_SIZE // PATCH_SIZE,
                           IMAGE_SIZE // PATCH_SIZE)
        # tolerance sized for bf16 inter-layer activations (f32 reference path)
        assert jnp.allclose(o, r, atol=5e-2, rtol=2e-2)

    print("KERNEL_OK")
</pallas_src>

<mosaic_0001>
module attributes {stable_mosaic.version = 11 : i64} {
  func.func @_probe_copy_kernel(%arg0: i32, %arg1: memref<8x128xf32, #tpu.memory_space<vmem>>, %arg2: memref<8x128xf32, #tpu.memory_space<vmem>>) attributes {dimension_semantics = [#tpu.dimension_semantics<arbitrary>], iteration_bounds = array<i64: 2>, scalar_prefetch = 0 : i64, scratch_operands = 0 : i64, tpu.core_type = #tpu.core_type<tc>, window_params = [{pipeline_mode = #tpu.pipeline_mode<synchronous>, transform_indices = @transform_0, window_bounds = array<i64: 8, 128>}, {transform_indices = @transform_1, window_bounds = array<i64: 8, 128>}]} {
    %c0 = arith.constant 0 : index
    %c0_0 = arith.constant 0 : index
    %0 = vector.load %arg1[%c0, %c0_0] : memref<8x128xf32, #tpu.memory_space<vmem>>, vector<8x128xf32>
    %c0_1 = arith.constant 0 : index
    %c0_2 = arith.constant 0 : index
    %1 = vector.load %arg2[%c0_1, %c0_2] : memref<8x128xf32, #tpu.memory_space<vmem>>, vector<8x128xf32>
    tpu.vector_store %arg2[%c0_1, %c0_2], %0 {strides = array<i32>} : memref<8x128xf32, #tpu.memory_space<vmem>>, vector<8x128xf32>,
    return
  }
  func.func @transform_0(%arg0: i32) -> (i32, i32) {
    %c0_i32 = arith.constant 0 : i32
    %c0_i32_0 = arith.constant 0 : i32
    %c0_i32_1 = arith.constant 0 : i32
    return %c0_i32, %c0_i32_0 : i32, i32
  }
  func.func @transform_1(%arg0: i32) -> (i32, i32) {
    %c0_i32 = arith.constant 0 : i32
    %c0_i32_0 = arith.constant 0 : i32
    return %arg0, %c0_i32 : i32, i32
  }
}

module attributes {stable_mosaic.version = 11 : i64} {
  func.func @patch_embed_kernel(%arg0: i32, %arg1: i32, %arg2: memref<1x128x256xbf16, #tpu.memory_space<vmem>>, %arg3: memref<256x32xbf16, #tpu.memory_space<vmem>>, %arg4: memref<128x32xf32, #tpu.memory_space<vmem>>, %arg5: memref<1x128x32xbf16, #tpu.memory_space<vmem>>) attributes {dimension_semantics = [#tpu.dimension_semantics<parallel>, #tpu.dimension_semantics<parallel>], iteration_bounds = array<i64: 2, 1>, scalar_prefetch = 0 : i64, scratch_operands = 0 : i64, tpu.core_type = #tpu.core_type<tc>, window_params = [{transform_indices = @transform_0, window_bounds = array<i64: 1, 128, 256>}, {pipeline_mode = #tpu.pipeline_mode<synchronous>, transform_indices = @transform_1, window_bounds = array<i64: 256, 32>}, {transform_indices = @transform_2, window_bounds = array<i64: 128, 32>}, {transform_indices = @transform_3, window_bounds = array<i64: 1, 128, 32>}]} {
    %c0 = arith.constant 0 : index
    %c0_0 = arith.constant 0 : index
    %c0_1 = arith.constant 0 : index
    %0 = vector.load %arg2[%c0, %c0_0, %c0_1] : memref<1x128x256xbf16, #tpu.memory_space<vmem>>, vector<1x128x256xbf16>
    %1 = vector.shape_cast %0 : vector<1x128x256xbf16> to vector<128x256xbf16>
    %c0_2 = arith.constant 0 : index
    %c0_3 = arith.constant 0 : index
    %2 = vector.load %arg3[%c0_2, %c0_3] : memref<256x32xbf16, #tpu.memory_space<vmem>>, vector<256x32xbf16>
    %cst = arith.constant dense<0.000000e+00> : vector<128x32xf32>
    %3 = tpu.matmul %1, %2, %cst {dimension_numbers = #tpu.dot_dimension_numbers<[1], [0], [0], [1], [0, 0, 1, 1], [], []>} : vector<128x256xbf16>, vector<256x32xbf16>, vector<128x32xf32> -> vector<128x32xf32>
    %c0_4 = arith.constant 0 : index
    %c0_5 = arith.constant 0 : index
    %4 = vector.load %arg4[%c0_4, %c0_5] : memref<128x32xf32, #tpu.memory_space<vmem>>, vector<128x32xf32>
    %5 = arith.addf %3, %4 : vector<128x32xf32>
    %6 = arith.truncf %5 : vector<128x32xf32> to vector<128x32xbf16>
    %c0_6 = arith.constant 0 : index
    %c0_7 = arith.constant 0 : index
    %c0_8 = arith.constant 0 : index
    %7 = vector.load %arg5[%c0_6, %c0_7, %c0_8] : memref<1x128x32xbf16, #tpu.memory_space<vmem>>, vector<1x128x32xbf16>
    %8 = vector.shape_cast %7 : vector<1x128x32xbf16> to vector<128x32xbf16>
    %9 = vector.shape_cast %6 : vector<128x32xbf16> to vector<1x128x32xbf16>
    tpu.vector_store %arg5[%c0_6, %c0_7, %c0_8], %9 {strides = array<i32>} : memref<1x128x32xbf16, #tpu.memory_space<vmem>>, vector<1x128x32xbf16>,
    return
  }
  func.func @transform_0(%arg0: i32, %arg1: i32) -> (i32, i32, i32) {
    %c0_i32 = arith.constant 0 : i32
    %c0_i32_0 = arith.constant 0 : i32
    return %arg0, %arg1, %c0_i32 : i32, i32, i32
  }
  func.func @transform_1(%arg0: i32, %arg1: i32) -> (i32, i32) {
    %c0_i32 = arith.constant 0 : i32
    %c0_i32_0 = arith.constant 0 : i32
    %c0_i32_1 = arith.constant 0 : i32
    return %c0_i32, %c0_i32_0 : i32, i32
  }
  func.func @transform_2(%arg0: i32, %arg1: i32) -> (i32, i32) {
    %c0_i32 = arith.constant 0 : i32
    %c0_i32_0 = arith.constant 0 : i32
    return %arg1, %c0_i32 : i32, i32
  }
  func.func @transform_3(%arg0: i32, %arg1: i32) -> (i32, i32, i32) {
    %c0_i32 = arith.constant 0 : i32
    %c0_i32_0 = arith.constant 0 : i32
    return %arg0, %arg1, %c0_i32 : i32, i32, i32
  }
}

</mosaic_0001>

<bundles_post_ra>
// kernel: tpu_custom_call.1
= control target key start
LH: loop header
LB: loop body
LE: loop exit
PB: predicated region body
PF: predicated region fallthrough
CT: control target
= control target key end

     0   :  { %6 = vsyncpa [#allocation3], 0  ;;  %s453_s0 = inlined_call_operand.hbm [shape: f32[8,128], index: 0, kind: input, shape index: {}]   ;;  %s454_s1 = inlined_call_operand.hbm [shape: f32[16,128], index: 1, kind: output, shape index: {}]  }
   0x1   :  { %7 = vsyncpa [#allocation4], 0 }
   0x2   :  { %9 = vsyncpa [#allocation4 + $0x1], 0  ;;  %s347_s6 = smov 0   ;;  %s349_s7 = smov 0  }
   0x3   :  { %s351_s8 = smov 0   ;;  %s353_s9 = smov 0  }
   0x4 LB: > { %s368_s10 = sadd.s32 4294967295, %s333_s9   ;;  %s183_s11 = sadd.s32 4294967294, %s333_s9   ;;  %s333_s9 = sphi %s353_s9, %s462_s9   ;;  %s329_s8 = sphi %s351_s8, %s461_s8   ;;  %s325_s7 = sphi %s349_s7, %s460_s7   ;;  %s321_s6 = sphi %s347_s6, %s459_s6  }
   0x5   : > { %s372_s12 = sadd.s32 1, %s333_s9   ;;  %s43_s13 = sadd.s32 1, %s329_s8 }
   0x6   : > { %s40_s14 = ssub.s32 %s333_s9, %s372_s12  ;;  %p53_p0 = scmp.ne.s32.totalorder %s329_s8, %s325_s7 }
   0x7   : > { %p41_p1 = scmp.eq.s32.totalorder %s40_s14, 0  ;;  %p54_p2 = scmp.eq.s32.totalorder %s368_s10, 1 }
   0x8   : > { %p59_p3 = scmp.ne.s32.totalorder %s325_s7, %s321_s6  ;;  %p60_p4 = scmp.eq.s32.totalorder %s183_s11, 1 }
   0x9   : > { %s383_s15 = scalar_select %p41_p1, %s329_s8, %s43_s13  }
   0xa   : > { %p385_p5 = por %p54_p2, %p53_p0  ;;  %p389_p6 = por %p60_p4, %p59_p3 }
   0xb   : > { %p184_p7 = scmp.ge.s32.totalorder %s333_s9, 1  ;;  %p67_p8 = scmp.lt.s32.totalorder %s333_s9, 3 }
   0xc   : > { %s456_s17 = scalar_select %p389_p6, 1, 0 }
   0xd   : > { %p207_p9 = scmp.eq.s32.totalorder %s368_s10, 0  ;;  %p396_p10 = pnand %p184_p7, %p67_p8 }
   0xe   : > { %s335_s19 = smov [#allocation2]  }
   0xf   : > { %s80_s20 = sshll.u32 %s335_s19, 4  ;;  %p199_p11 = pneg %p396_p10  ;;  %s81_s20 = int_to_ptr.vmem [resolvable:$true] %s80_s20 }
  0x10   : > { %s254_s21 = scalar_lea.vmem %s81_s20, 128  ;;  %p262_p3 = scmp.lt.s32.totalorder %s81_s20, %s81_s20 }
  0x11   : > { %p200_p12 = pnand %p207_p9, %p199_p11  ;;  %p255_p0 = scmp.ne.s32.totalorder %s81_s20, %s254_s21 }
  0x12   : > { %p263_p4 = scmp.lt.s32.totalorder %s254_s21, %s254_s21 }
  0x13   : > { %p245_p13 = pneg %p200_p12 }
  0x14   : > { %p264_p6 = por %p263_p4, %p262_p3 }
  0x15   : > { %p257_p1 = pnand %p255_p0, %p245_p13 }
  0x17   : > { %p258_p2 = pneg %p257_p1 }
  0x19   : > { %p265_p7 = pnand %p264_p6, %p258_p2 }
  0x1b   : > { %268 = shalt.err (!%p265_p7)
}
  0x1c   : > { %202 = dma.hbm_to_vmem [thread:$0]  (!%p200_p12), %s453_s0, 128, %s81_s20, [#allocation3]  }
  0x1d   : > { %93 = sbr.rel (%p396_p10) target bundleno = 60 (0x3c), region = 24 }
  0x22   : > { %312 = dma.done.wait (%p207_p9), [#allocation3], 128  }
  0x23   : > { %314 = vsyncadd (%p207_p9), [#allocation3], 4294967168  ;;  %s105_s24 = sand.u32 1, %s325_s7   ;;  %s190_s28 = sshll.u32 %s368_s10, 7  ;;  %v108_v0 = vld [vmem:[#allocation2] sm:$0xff] }
  0x24   : > { %s188_s25 = sshll.u32 %s105_s24, 3  ;;  %s122_s2 = scalar_lea.hbm %s454_s1, %s190_s28 }
  0x25   : > { %s107_s26 = scalar_lea.vmem [#allocation5], %s188_s25  ;;  %s111_s3 = scalar_lea.sflag [#allocation4], %s105_s24 }
  0x26   : > { %s124_s27 = sshll.u32 %s107_s26, 4  ;;  %109 = vst [vmem:[%s107_s26] sm:$0xff] %v108_v0  ;;  %s336_s5 = smov [#allocation5]   ;;  %s415_s27 = int_to_ptr.vmem [resolvable:$true] %s124_s27 }
  0x27   : > { %s269_s4 = scalar_lea.vmem %s415_s27, 128  ;;  %s273_s11 = sshll.u32 %s336_s5, 4  ;;  %s274_s11 = int_to_ptr.vmem [resolvable:$false] %s273_s11 }
  0x28   : > { %p270_p6 = scmp.ne.s32.totalorder %s415_s27, %s269_s4  ;;  %s275_s10 = scalar_lea.vmem %s274_s11, 256 }
  0x29   : > { %p276_p10 = scmp.lt.s32.totalorder %s415_s27, %s274_s11  ;;  %p277_p11 = scmp.lt.s32.totalorder %s275_s10, %s269_s4 }
  0x2a   : > { %p271_p8 = pnand %p270_p6, %p385_p5 }
  0x2b   : > { %p278_p12 = por %p277_p11, %p276_p10 }
  0x2c   : > { %p272_p9 = pneg %p271_p8 }
  0x2e   : > { %p279_p13 = pnand %p278_p12, %p272_p9 }
  0x30   : > { %282 = shalt.err (!%p279_p13)
}
  0x31   : > { %s283_s13 = scalar_lea.hbm %s122_s2, 128  ;;  %s287_s19 = scalar_lea.hbm %s454_s1, 256 }
  0x32   : > { %p284_p0 = scmp.ne.s32.totalorder %s122_s2, %s283_s13  ;;  %p288_p3 = scmp.lt.s32.totalorder %s122_s2, %s454_s1 }
  0x33   : > { %p289_p4 = scmp.lt.s32.totalorder %s287_s19, %s283_s13 }
  0x34   : > { %p285_p1 = pnand %p284_p0, %p385_p5 }
  0x35   : > { %p290_p7 = por %p289_p4, %p288_p3 }
  0x36   : > { %p286_p2 = pneg %p285_p1 }
  0x38   : > { %p291_p6 = pnand %p290_p7, %p286_p2 }
  0x3a   : > { %294 = shalt.err (!%p291_p6)
}
  0x3b   : > { %197 = dma.vmem_to_hbm [thread:$0]  (%p385_p5), %s415_s27, 128, %s122_s2, %s111_s3  }
  0x3c PF: > { %p209_p8 = scmp.ge.s32.totalorder %s333_s9, 2  ;;  %s136_s22 = sand.u32 1, %s321_s6  }
  0x3d   : > { %p458_p9 = scmp.ne.s32.totalorder %s456_s17, 0  ;;  %s137_s23 = scalar_lea.sflag [#allocation4], %s136_s22 }
  0x3f   : > { %p204_p10 = pnand %p209_p8, %p458_p9 }
  0x41   : > { %p205_p11 = pneg %p204_p10 }
  0x43   : > { %316 = dma.done.wait (%p205_p11), %s137_s23, 128  }
  0x44   : > { %318 = vsyncadd (%p205_p11), %s137_s23, 4294967168  ;;  %p12_p12 = scmp.ge.s32.totalorder %s372_s12, 4   ;;  %s459_s6 = smov %s325_s7 }
  0x45   : > { %s460_s7 = smov %s329_s8  ;;  %s461_s8 = smov %s383_s15 }
  0x46   : > { %s462_s9 = smov %s372_s12  ;;  %14 = sbr.rel (!%p12_p12) target bundleno = 4 (0x4), region = 61 }
  0x4b   :  { %142 = vsyncpa [#allocation3], 1 }
  0x4c   :  { %144 = vsyncpa [#allocation3 + $0x1], 1 }
  0x4d   :  { %145 = vsyncpa [#allocation4], 1 }
  0x4e   :  { %147 = vsyncpa [#allocation4 + $0x1], 1 }

// kernel: tpu_custom_call.1
= control target key start
LH: loop header
LB: loop body
LE: loop exit
PB: predicated region body
PF: predicated region fallthrough
CT: control target
= control target key end

     0   :  { %s1025_s12 = smov 0   ;;  %s1027_s13 = smov 0   ;;  %s1210_s0 = inlined_call_operand.vmem [shape: bf16[2,128,256], index: 0, kind: input, shape index: {}]   ;;  %s1211_s1 = inlined_call_operand.vmem [shape: bf16[256,32], index: 1, kind: input, shape index: {}]   ;;  %s1212_s2 = inlined_call_operand.vmem [shape: f32[128,32], index: 2, kind: input, shape index: {}]   ;;  %s1213_s3 = inlined_call_operand.vmem [shape: bf16[2,128,32], index: 3, kind: output, shape index: {}]  }
   0x1   :  { %s1029_s14 = smov 0  }
   0x2 LB: > { %s25_s15 = sadd.s32 1, %s999_s13  ;;  %p764_p0 = scmp.ge.s32.totalorder %s1003_s14, 1  ;;  %s1003_s14 = sphi %s1029_s14, %s13_s14   ;;  %s999_s13 = sphi %s1027_s13, %s1215_s13   ;;  %s995_s12 = sphi %s1025_s12, %s1214_s12  }
   0x3   : > { %p27_p1 = scmp.ge.s32.totalorder %s25_s15, 2  ;;  %p170_p2 = scmp.lt.s32.totalorder %s1003_s14, 3 }
   0x5   : > { %s1217_s15 = smov (%p27_p1, %s25_s15), 0  ;;  %p171_p3 = pnand %p764_p0, %p170_p2 }
   0x6   : > { %p209_p4 = scmp.lt.s32.totalorder (!%p171_p3), %s995_s12, 1 }
   0x7   : > { %174 = sbr.rel (%p171_p3) target bundleno = 275 (0x113), region = 32 }
   0xc   : > { %v941_v0 = vld [vmem:[%s1211_s1 + $0x78] sm:$0xff]   ;;  %v943_v2 = vld [vmem:[%s1211_s1 + $0x70] sm:$0xff]   ;;  %v945_v4 = vld [vmem:[%s1211_s1 + $0x68] sm:$0xff]   ;;  %s1219_s12 = smov (!%p209_p4, %s995_s12), 1  ;;  %vm637_vm0 = vcmask 257024  }
   0xd   : > { %v942_v1 = vld [vmem:[%s1211_s1 + $0x38] sm:$0xff]   ;;  %837 = vmatprep.subr.bf16.mxu0 %v941_v0  ;;  %901 = vmatprep.subr.bf16.mxu1 %v941_v0  ;;  %v944_v3 = vld [vmem:[%s1211_s1 + $0x30] sm:$0xff]   ;;  %v946_v5 = vld [vmem:[%s1211_s1 + $0x28] sm:$0xff]   ;;  %s819_s5 = sshll.u32 %s1219_s12, 7  ;;  %s820_s6 = sshll.u32 %s1219_s12, 6 }
   0xe   : > { %838 = vmatpush3.bf16.msra.mxu0 %v942_v1  ;;  %909 = vmatpush3.bf16.msra.mxu1 %v942_v1  ;;  %v947_v6 = vld [vmem:[%s1211_s1 + $0x60] sm:$0xff]   ;;  %v949_v8 = vld [vmem:[%s1211_s1 + $0x58] sm:$0xff]   ;;  %s1076_s10 = scalar_lea.vmem %s1210_s0, %s819_s5  ;;  %v951_v10 = vld [vmem:[%s1211_s1 + $0x50] sm:$0xff]   ;;  %s1125_s9 = scalar_lea.vmem %s1213_s3, %s820_s6 }
   0xf   : > { %839 = vmatprep.subr.bf16.mxu0 %v943_v2  ;;  %902 = vmatprep.subr.bf16.mxu1 %v943_v2  ;;  %v948_v7 = vld [vmem:[%s1211_s1 + $0x20] sm:$0xff]   ;;  %v950_v9 = vld [vmem:[%s1211_s1 + $0x18] sm:$0xff]   ;;  %v952_v13 = vld [vmem:[%s1211_s1 + $0x10] sm:$0xff]  }
  0x10   : > { %v959_v11 = vld [vmem:[%s1076_s10 + $0x4] ss:$8 sps:$4 sm:$0xff]   ;;  %v957_v18 = vld [vmem:[%s1076_s10] ss:$8 sps:$4 sm:$0xff]   ;;  %v963_v20 = vld [vmem:[%s1076_s10 + $0x14] ss:$8 sps:$4 sm:$0xff]  }
  0x11   : > { %v962_v12 = vld [vmem:[%s1076_s10 + $0x44] ss:$8 sps:$4 sm:$0xff]   ;;  %508 = vmatprep.mubr.bf16.mxu0 %v959_v11  ;;  %v960_v19 = vld [vmem:[%s1076_s10 + $0x40] ss:$8 sps:$4 sm:$0xff]   ;;  %v965_v21 = vld [vmem:[%s1076_s10 + $0x54] ss:$8 sps:$4 sm:$0xff]  }
  0x12   : > { %840 = vmatpush3.bf16.msra.mxu0 %v944_v3  ;;  %910 = vmatpush3.bf16.msra.mxu1 %v944_v3  ;;  %v953_v14 = vld [vmem:[%s1211_s1 + $0x48] sm:$0xff]   ;;  %v955_v16 = vld [vmem:[%s1211_s1 + $0x40] sm:$0xff]   ;;  %v967_v22 = vld [vmem:[%s1076_s10 + $0x10] ss:$8 sps:$4 sm:$0xff]  }
  0x13   : > { %841 = vmatprep.subr.bf16.mxu0 %v945_v4  ;;  %903 = vmatprep.subr.bf16.mxu1 %v945_v4  ;;  %v954_v15 = vld [vmem:[%s1211_s1 + $0x8] sm:$0xff]   ;;  %v956_v17 = vld [vmem:[%s1211_s1] sm:$0xff]   ;;  %v968_v23 = vld [vmem:[%s1076_s10 + $0x50] ss:$8 sps:$4 sm:$0xff]  }
  0x14   : > { %540 = vmatprep.mubr.bf16.mxu1 %v962_v12  ;;  %v969_v24 = vld [vmem:[%s1076_s10 + $0x24] ss:$8 sps:$4 sm:$0xff]   ;;  %v973_v26 = vld [vmem:[%s1076_s10 + $0x20] ss:$8 sps:$4 sm:$0xff]   ;;  %v975_v28 = vld [vmem:[%s1076_s10 + $0x34] ss:$8 sps:$4 sm:$0xff]  }
  0x15   : > { %v971_v25 = vld [vmem:[%s1076_s10 + $0x64] ss:$8 sps:$4 sm:$0xff]   ;;  %v974_v27 = vld [vmem:[%s1076_s10 + $0x60] ss:$8 sps:$4 sm:$0xff]   ;;  %v977_v29 = vld [vmem:[%s1076_s10 + $0x74] ss:$8 sps:$4 sm:$0xff]  }
  0x16   : > { %842 = vmatpush3.bf16.msra.mxu0 %v946_v5  ;;  %911 = vmatpush3.bf16.msra.mxu1 %v946_v5  ;;  %v979_v30 = vld [vmem:[%s1076_s10 + $0x30] ss:$8 sps:$4 sm:$0xff]   ;;  %v284_v34 = vld [vmem:[%s1212_s2] sm:$0xff]  ;;  %v285_v44 = vld [vmem:[%s1212_s2 + $0x8] sm:$0xff] }
  0x17   : > { %843 = vmatprep.subr.bf16.mxu0 %v947_v6  ;;  %904 = vmatprep.subr.bf16.mxu1 %v947_v6  ;;  %v980_v31 = vld [vmem:[%s1076_s10 + $0x70] ss:$8 sps:$4 sm:$0xff]   ;;  %v292_v36 = vld [vmem:[%s1212_s2 + $0x40] sm:$0xff]  ;;  %v293_v46 = vld [vmem:[%s1212_s2 + $0x48] sm:$0xff] }
  0x18   : > { %v286_v56 = vld [vmem:[%s1212_s2 + $0x10] sm:$0xff]  ;;  %v287_v4 = vld [vmem:[%s1212_s2 + $0x18] sm:$0xff] }
  0x19   : > { %v294_v58 = vld [vmem:[%s1212_s2 + $0x50] sm:$0xff]  ;;  %v295_v6 = vld [vmem:[%s1212_s2 + $0x58] sm:$0xff] }
  0x1a   : > { %844 = vmatpush3.bf16.msra.mxu0 %v948_v7  ;;  %912 = vmatpush3.bf16.msra.mxu1 %v948_v7 }
  0x1b   : > { %845 = vmatprep.subr.bf16.mxu0 %v949_v8  ;;  %905 = vmatprep.subr.bf16.mxu1 %v949_v8 }
  0x1e   : > { %846 = vmatpush3.bf16.msra.mxu0 %v950_v9  ;;  %913 = vmatpush3.bf16.msra.mxu1 %v950_v9 }
  0x1f   : > { %847 = vmatprep.subr.bf16.mxu0 %v951_v10  ;;  %906 = vmatprep.subr.bf16.mxu1 %v951_v10 }
  0x22   : > { %848 = vmatpush3.bf16.msra.mxu0 %v952_v13  ;;  %914 = vmatpush3.bf16.msra.mxu1 %v952_v13 }
  0x23   : > { %849 = vmatprep.subr.bf16.mxu0 %v953_v14  ;;  %907 = vmatprep.subr.bf16.mxu1 %v953_v14 }
  0x26   : > { %850 = vmatpush3.bf16.msra.mxu0 %v954_v15  ;;  %915 = vmatpush3.bf16.msra.mxu1 %v954_v15 }
  0x27   : > { %851 = vmatprep.subr.bf16.mxu0 %v955_v16  ;;  %908 = vmatprep.subr.bf16.mxu1 %v955_v16  ;;  %v288_v16 = vld [vmem:[%s1212_s2 + $0x20] sm:$0xff] }
  0x2a   : > { %852 = vmatpush3.bf16.msra.mxu0 %v956_v17  ;;  %916 = vmatpush3.bf16.msra.mxu1 %v956_v17 }
  0x2d   : > { %509 = vmatmul.mubr.bf16.vlgmr.msra.gmra.mxu0 %v957_v18  ;;  %541 = vmatmul.mubr.bf16.vlgmr.msra.gmra.mxu1 %v960_v19  ;;  %v296_v18 = vld [vmem:[%s1212_s2 + $0x60] sm:$0xff] }
  0x2e   : > { %516 = vmatprep.mubr.bf16.mxu0 %v963_v20  ;;  %548 = vmatprep.mubr.bf16.mxu1 %v965_v21 }
  0x35   : > { %517 = vmatmul.mubr.bf16.gmra.mxu0 %v967_v22  ;;  %549 = vmatmul.mubr.bf16.gmra.mxu1 %v968_v23 }
  0x36   : > { %524 = vmatprep.mubr.bf16.mxu0 %v969_v24  ;;  %556 = vmatprep.mubr.bf16.mxu1 %v971_v25 }
  0x3d   : > { %525 = vmatmul.mubr.bf16.gmra.mxu0 %v973_v26  ;;  %557 = vmatmul.mubr.bf16.gmra.mxu1 %v974_v27 }
  0x3e   : > { %532 = vmatprep.mubr.bf16.mxu0 %v975_v28  ;;  %564 = vmatprep.mubr.bf16.mxu1 %v977_v29  ;;  %v289_v28 = vld [vmem:[%s1212_s2 + $0x28] sm:$0xff] }
  0x45   : > { %533 = vmatmul.mubr.bf16.gmra.mxu0 %v979_v30  ;;  %565 = vmatmul.mubr.bf16.gmra.mxu1 %v980_v31  ;;  %v297_v30 = vld [vmem:[%s1212_s2 + $0x68] sm:$0xff] }
  0xed   : > { %v853_v32 = vpop.f32.mrf.mxu0  ;;  %v877_v33 = vpop.f32.mrf.mxu1 }
  0xef   : > { %v854_v35 = vpop.f32.mrf.mxu0  ;;  %v878_v37 = vpop.f32.mrf.mxu1 }
  0xf0   : > { %v855_v38 = vadd.f32 %v854_v35, %v853_v32  ;;  %v879_v39 = vadd.f32 %v878_v37, %v877_v33 }
  0xf1   : > { %v856_v40 = vpop.f32.mrf.mxu0  ;;  %v880_v41 = vpop.f32.mrf.mxu1 }
  0xf2   : > { %v511_v42 = vadd.f32 %v855_v38, %v284_v34  ;;  %v543_v43 = vadd.f32 %v879_v39, %v292_v36 }
  0xf3   : > { %v857_v45 = vpop.f32.mrf.mxu0  ;;  %v881_v47 = vpop.f32.mrf.mxu1 }
  0xf4   : > { %v821_v48 = vpack.c.bf16 %v511_v42, %v511_v42  ;;  %v829_v49 = vpack.c.bf16 %v543_v43, %v543_v43  ;;  %v858_v50 = vadd.f32 %v857_v45, %v856_v40  ;;  %v882_v51 = vadd.f32 %v881_v47, %v880_v41  ;;  %v290_v40 = vld [vmem:[%s1212_s2 + $0x30] sm:$0xff] }
  0xf5   : > { %v859_v52 = vpop.f32.mrf.mxu0  ;;  %v883_v53 = vpop.f32.mrf.mxu1  ;;  %v298_v42 = vld [vmem:[%s1212_s2 + $0x70] sm:$0xff] }
  0xf6   : > { %638 = vst.msk [vmem:[%s1125_s9] sm:$0xf] %vm637_vm0, %v821_v48  ;;  %646 = vst.msk [vmem:[%s1125_s9 + $0x20] sm:$0xf] %vm637_vm0, %v829_v49  ;;  %v514_v54 = vadd.f32 %v858_v50, %v285_v44  ;;  %v546_v55 = vadd.f32 %v882_v51, %v293_v46 }
  0xf7   : > { %v860_v57 = vpop.f32.mrf.mxu0  ;;  %v884_v59 = vpop.f32.mrf.mxu1 }
  0xf8   : > { %v822_v60 = vpack.c.bf16 %v514_v54, %v514_v54  ;;  %v830_v61 = vpack.c.bf16 %v546_v55, %v546_v55  ;;  %v861_v62 = vadd.f32 %v860_v57, %v859_v52  ;;  %v885_v63 = vadd.f32 %v884_v59, %v883_v53  ;;  %v291_v52 = vld [vmem:[%s1212_s2 + $0x38] sm:$0xff] }
  0xf9   : > { %v862_v0 = vpop.f32.mrf.mxu0  ;;  %v886_v1 = vpop.f32.mrf.mxu1  ;;  %v299_v54 = vld [vmem:[%s1212_s2 + $0x78] sm:$0xff] }
  0xfa   : > { %639 = vst.msk [vmem:[%s1125_s9 + $0x4] sm:$0xf] %vm637_vm0, %v822_v60  ;;  %647 = vst.msk [vmem:[%s1125_s9 + $0x24] sm:$0xf] %vm637_vm0, %v830_v61  ;;  %v519_v2 = vadd.f32 %v861_v62, %v286_v56  ;;  %v551_v3 = vadd.f32 %v885_v63, %v294_v58 }
  0xfb   : > { %v863_v5 = vpop.f32.mrf.mxu0  ;;  %v887_v7 = vpop.f32.mrf.mxu1 }
  0xfc   : > { %v823_v8 = vpack.c.bf16 %v519_v2, %v519_v2  ;;  %v831_v9 = vpack.c.bf16 %v551_v3, %v551_v3  ;;  %v864_v10 = vadd.f32 %v863_v5, %v862_v0  ;;  %v888_v11 = vadd.f32 %v887_v7, %v886_v1 }
  0xfd   : > { %v865_v12 = vpop.f32.mrf.mxu0  ;;  %v889_v13 = vpop.f32.mrf.mxu1 }
  0xfe   : > { %640 = vst.msk [vmem:[%s1125_s9 + $0x8] sm:$0xf] %vm637_vm0, %v823_v8  ;;  %648 = vst.msk [vmem:[%s1125_s9 + $0x28] sm:$0xf] %vm637_vm0, %v831_v9  ;;  %v522_v14 = vadd.f32 %v864_v10, %v287_v4  ;;  %v554_v15 = vadd.f32 %v888_v11, %v295_v6 }
  0xff   : > { %v866_v17 = vpop.f32.mrf.mxu0  ;;  %v890_v19 = vpop.f32.mrf.mxu1 }
 0x100   : > { %v824_v20 = vpack.c.bf16 %v522_v14, %v522_v14  ;;  %v832_v21 = vpack.c.bf16 %v554_v15, %v554_v15  ;;  %v867_v22 = vadd.f32 %v866_v17, %v865_v12  ;;  %v891_v23 = vadd.f32 %v890_v19, %v889_v13 }
 0x101   : > { %v868_v24 = vpop.f32.mrf.mxu0  ;;  %v892_v25 = vpop.f32.mrf.mxu1 }
 0x102   : > { %641 = vst.msk [vmem:[%s1125_s9 + $0xc] sm:$0xf] %vm637_vm0, %v824_v20  ;;  %649 = vst.msk [vmem:[%s1125_s9 + $0x2c] sm:$0xf] %vm637_vm0, %v832_v21  ;;  %v527_v26 = vadd.f32 %v867_v22, %v288_v16  ;;  %v559_v27 = vadd.f32 %v891_v23, %v296_v18 }
 0x103   : > { %v869_v29 = vpop.f32.mrf.mxu0  ;;  %v893_v31 = vpop.f32.mrf.mxu1 }
 0x104   : > { %v825_v32 = vpack.c.bf16 %v527_v26, %v527_v26  ;;  %v833_v33 = vpack.c.bf16 %v559_v27, %v559_v27  ;;  %v870_v34 = vadd.f32 %v869_v29, %v868_v24  ;;  %v894_v35 = vadd.f32 %v893_v31, %v892_v25 }
 0x105   : > { %v871_v36 = vpop.f32.mrf.mxu0  ;;  %v895_v37 = vpop.f32.mrf.mxu1 }
 0x106   : > { %642 = vst.msk [vmem:[%s1125_s9 + $0x10] sm:$0xf] %vm637_vm0, %v825_v32  ;;  %650 = vst.msk [vmem:[%s1125_s9 + $0x30] sm:$0xf] %vm637_vm0, %v833_v33  ;;  %v530_v38 = vadd.f32 %v870_v34, %v289_v28  ;;  %v562_v39 = vadd.f32 %v894_v35, %v297_v30 }
 0x107   : > { %v872_v41 = vpop.f32.mrf.mxu0  ;;  %v896_v43 = vpop.f32.mrf.mxu1 }
 0x108   : > { %v826_v44 = vpack.c.bf16 %v530_v38, %v530_v38  ;;  %v834_v45 = vpack.c.bf16 %v562_v39, %v562_v39  ;;  %v873_v46 = vadd.f32 %v872_v41, %v871_v36  ;;  %v897_v47 = vadd.f32 %v896_v43, %v895_v37 }
 0x109   : > { %v874_v48 = vpop.f32.mrf.mxu0  ;;  %v898_v49 = vpop.f32.mrf.mxu1 }
 0x10a   : > { %643 = vst.msk [vmem:[%s1125_s9 + $0x14] sm:$0xf] %vm637_vm0, %v826_v44  ;;  %651 = vst.msk [vmem:[%s1125_s9 + $0x34] sm:$0xf] %vm637_vm0, %v834_v45  ;;  %v535_v50 = vadd.f32 %v873_v46, %v290_v40  ;;  %v567_v51 = vadd.f32 %v897_v47, %v298_v42 }
 0x10b   : > { %v875_v53 = vpop.f32.mrf.mxu0  ;;  %v899_v55 = vpop.f32.mrf.mxu1 }
 0x10c   : > { %v827_v56 = vpack.c.bf16 %v535_v50, %v535_v50  ;;  %v835_v57 = vpack.c.bf16 %v567_v51, %v567_v51  ;;  %v876_v58 = vadd.f32 %v875_v53, %v874_v48  ;;  %v900_v59 = vadd.f32 %v899_v55, %v898_v49 }
 0x10e   : > { %644 = vst.msk [vmem:[%s1125_s9 + $0x18] sm:$0xf] %vm637_vm0, %v827_v56  ;;  %652 = vst.msk [vmem:[%s1125_s9 + $0x38] sm:$0xf] %vm637_vm0, %v835_v57  ;;  %v538_v60 = vadd.f32 %v876_v58, %v291_v52  ;;  %v570_v61 = vadd.f32 %v900_v59, %v299_v54 }
 0x110   : > { %v828_v62 = vpack.c.bf16 %v538_v60, %v538_v60  ;;  %v836_v63 = vpack.c.bf16 %v570_v61, %v570_v61 }
 0x112   : > { %645 = vst.msk [vmem:[%s1125_s9 + $0x1c] sm:$0xf] %vm637_vm0, %v828_v62  ;;  %653 = vst.msk [vmem:[%s1125_s9 + $0x3c] sm:$0xf] %vm637_vm0, %v836_v63 }
 0x113 PF: > { %s13_s14 = sadd.s32 1, %s1003_s14   ;;  %s1214_s12 = smov %s999_s13 }
 0x114   : > { %p10_p5 = scmp.ge.s32.totalorder %s13_s14, 4   ;;  %s1215_s13 = smov %s1217_s15 }
 0x116   :  { %12 = sbr.rel (!%p10_p5) target bundleno = 2 (0x2), region = 65 }

</bundles_post_ra>
